<compile_context>
chip_gen: v7x
topology: tpu7x:2x2x1
jax: 0.10.0
libtpu: 0.0.40
codegen_flags: <defaults>
</compile_context>

<pallas_src>
import jax
import jax.numpy as jnp
from jax.experimental import pallas as pl
from jax.experimental.pallas import tpu as pltpu


def _fused_linear_add_relu_kernel(x_ref, w_ref, b_ref, add_ref, o_ref):
    # x_ref:   SMEM (1, 2) f32  -- x1
    # w_ref:   SMEM (1, 2) f32  -- Linear(2,1).weight
    # b_ref:   SMEM (1,)   f32  -- Linear(2,1).bias
    # add_ref: VMEM (1, 2) f32  -- input2 (module-level constant in the spec)
    # o_ref:   VMEM (1, 2) f32  -- output
    #
    # Linear(2 -> 1) as an explicit 2-term multiply-add on scalars
    # (no XLU lane reduction, no MXU).
    v1 = x_ref[0, 0] * w_ref[0, 0] + x_ref[0, 1] * w_ref[0, 1] + b_ref[0]
    v2 = v1 + add_ref[...]                 # scalar splat + (1,2) vector add
    o_ref[...] = jnp.maximum(v2, 0.0)      # relu (NaN-propagating, like torch)


def model_forward(x1, weight, bias, input2):
    """Fused Linear(2->1) + add(input2) + relu as a single Pallas call."""
    # Layout is hard-wired to the module's shapes; fail loudly otherwise.
    assert x1.shape == (1, 2), x1.shape
    assert weight.shape == (1, 2), weight.shape
    assert bias.shape == (1,), bias.shape
    assert input2.shape == (1, 2), input2.shape

    smem = pl.BlockSpec(memory_space=pltpu.MemorySpace.SMEM)
    vmem = pl.BlockSpec(memory_space=pltpu.MemorySpace.VMEM)

    return pl.pallas_call(
        _fused_linear_add_relu_kernel,
        out_shape=jax.ShapeDtypeStruct(input2.shape, jnp.float32),
        in_specs=[smem, smem, smem, vmem],
        out_specs=vmem,
        cost_estimate=pl.CostEstimate(flops=8, transcendentals=0,
                                      bytes_accessed=40),
    )(x1.astype(jnp.float32), weight.astype(jnp.float32),
      bias.astype(jnp.float32), input2.astype(jnp.float32))


def reference_forward(x1, weight, bias, input2):
    v1 = x1 @ weight.T + bias
    v2 = v1 + input2
    return jnp.maximum(v2, 0.0)


if __name__ == "__main__":
    key = jax.random.PRNGKey(0)
    k_x, k_w, k_b, k_in2 = jax.random.split(key, 4)

    # Deterministic parameters / inputs (shapes from the PyTorch module)
    x1 = jax.random.normal(k_x, (1, 2), dtype=jnp.float32)
    weight = jax.random.normal(k_w, (1, 2), dtype=jnp.float32) * 0.5   # Linear(2,1).weight
    bias = jax.random.normal(k_b, (1,), dtype=jnp.float32) * 0.5       # Linear(2,1).bias
    input2 = jax.random.normal(k_in2, (1, 2), dtype=jnp.float32)       # module-level constant

    out = model_forward(x1, weight, bias, input2)
    out = jax.block_until_ready(out)

    ref = reference_forward(x1, weight, bias, input2)
    assert out.shape == (1, 2)
    assert jnp.allclose(out, ref, atol=1e-5, rtol=1e-5), (out, ref)

    print("KERNEL_OK")
</pallas_src>

<mosaic_0001>
module attributes {stable_mosaic.version = 11 : i64} {
  func.func @_fused_linear_add_relu_kernel(%arg0: memref<1x2xf32, #tpu.memory_space<smem>>, %arg1: memref<1x2xf32, #tpu.memory_space<smem>>, %arg2: memref<1xf32, #tpu.memory_space<smem>>, %arg3: memref<1x2xf32, #tpu.memory_space<vmem>>, %arg4: memref<1x2xf32, #tpu.memory_space<vmem>>) attributes {dimension_semantics = [], scalar_prefetch = 0 : i64, scratch_operands = 0 : i64, tpu.core_type = #tpu.core_type<tc>} {
    %c0 = arith.constant 0 : index
    %c0_0 = arith.constant 0 : index
    %0 = memref.load %arg0[%c0, %c0_0] : memref<1x2xf32, #tpu.memory_space<smem>>
    %c0_1 = arith.constant 0 : index
    %c0_2 = arith.constant 0 : index
    %1 = memref.load %arg1[%c0_1, %c0_2] : memref<1x2xf32, #tpu.memory_space<smem>>
    %2 = arith.mulf %0, %1 : f32
    %c0_3 = arith.constant 0 : index
    %c1 = arith.constant 1 : index
    %3 = memref.load %arg0[%c0_3, %c1] : memref<1x2xf32, #tpu.memory_space<smem>>
    %c0_4 = arith.constant 0 : index
    %c1_5 = arith.constant 1 : index
    %4 = memref.load %arg1[%c0_4, %c1_5] : memref<1x2xf32, #tpu.memory_space<smem>>
    %5 = arith.mulf %3, %4 : f32
    %6 = arith.addf %2, %5 : f32
    %c0_6 = arith.constant 0 : index
    %7 = memref.load %arg2[%c0_6] : memref<1xf32, #tpu.memory_space<smem>>
    %8 = arith.addf %6, %7 : f32
    %c0_7 = arith.constant 0 : index
    %c0_8 = arith.constant 0 : index
    %9 = vector.load %arg3[%c0_7, %c0_8] : memref<1x2xf32, #tpu.memory_space<vmem>>, vector<1x2xf32>
    %10 = vector.broadcast %8 : f32 to vector<1x2xf32>
    %11 = arith.addf %10, %9 : vector<1x2xf32>
    %cst = arith.constant 0.000000e+00 : f32
    %12 = vector.broadcast %cst : f32 to vector<1x2xf32>
    %13 = arith.maximumf %11, %12 : vector<1x2xf32>
    %c0_9 = arith.constant 0 : index
    %c0_10 = arith.constant 0 : index
    %14 = vector.load %arg4[%c0_9, %c0_10] : memref<1x2xf32, #tpu.memory_space<vmem>>, vector<1x2xf32>
    tpu.vector_store %arg4[%c0_9, %c0_10], %13 {strides = array<i32>} : memref<1x2xf32, #tpu.memory_space<vmem>>, vector<1x2xf32>,
    return
  }
}

</mosaic_0001>

<bundles_post_ra>
// kernel: tpu_custom_call.1
= control target key start
LH: loop header
LB: loop body
LE: loop exit
PB: predicated region body
PF: predicated region fallthrough
CT: control target
= control target key end

     0   :  { %10 = vsyncpa [#allocation5], 0  ;;  %s184_s0 = inlined_call_operand.vmem [shape: f32[1,2], index: 0, kind: input, shape index: {}]   ;;  %s185_s1 = inlined_call_operand.vmem [shape: f32[1,2], index: 1, kind: input, shape index: {}]   ;;  %s186_s2 = inlined_call_operand.<no memory space> [shape: f32[1], index: 2, kind: input, shape index: {}]   ;;  %s187_s3 = inlined_call_operand.vmem [shape: f32[1,2], index: 3, kind: input, shape index: {}]   ;;  %s188_s4 = inlined_call_operand.hbm [shape: f32[1,2], index: 4, kind: output, shape index: {}]  }
   0x1   :  { %11 = vsyncpa [#allocation7], 0 }
   0x2   :  { %12 = vsyncpa [#allocation4], 0  ;;  %s19_s17 = sshll.u32 %s184_s0, 4  ;;  %s29_s20 = sshll.u32 %s185_s1, 4  ;;  %s20_s17 = int_to_ptr.vmem [resolvable:$true] %s19_s17  ;;  %s30_s20 = int_to_ptr.vmem [resolvable:$true] %s29_s20 }
   0x3   :  { %s80_s21 = scalar_lea.vmem %s20_s17, 16  ;;  %p85_p1 = scmp.lt.s32.totalorder %s20_s17, %s20_s17 }
   0x4   :  { %p81_p0 = scmp.ne.s32.totalorder %s20_s17, %s80_s21  ;;  %p86_p2 = scmp.lt.s32.totalorder %s80_s21, %s80_s21 }
   0x6   :  { %p87_p3 = por %p86_p2, %p85_p1 }
   0x8   :  { %p88_p4 = pnand %p87_p3, %p81_p0 }
   0xa   :  { %91 = shalt.err (!%p88_p4)
}
   0xb   :  { %s132_s22 = smov [#allocation3]   ;;  %s92_s23 = scalar_lea.vmem %s30_s20, 16 }
   0xc   :  { %22 = dma.vmem_to_smem %s20_s17, 16, %s132_s22, [#allocation5]  }
   0xd   :  { %p93_p5 = scmp.ne.s32.totalorder %s30_s20, %s92_s23  ;;  %p97_p6 = scmp.lt.s32.totalorder %s30_s20, %s30_s20 }
   0xe   :  { %p98_p7 = scmp.lt.s32.totalorder %s92_s23, %s92_s23 }
  0x10   :  { %p99_p8 = por %p98_p7, %p97_p6 }
  0x12   :  { %p100_p9 = pnand %p99_p8, %p93_p5 }
  0x14   :  { %103 = shalt.err (!%p100_p9)
}
  0x15   :  { %s133_s0 = smov [#allocation6]  }
  0x16   :  { %32 = dma.vmem_to_smem %s30_s20, 16, %s133_s0, [#allocation7]  }
  0x17   :  { %126 = dma.done.wait [#allocation5], 16  }
  0x18   :  { %127 = vsyncadd [#allocation5], 4294967280 }
  0x19   :  { %128 = dma.done.wait [#allocation7], 16  }
  0x1a   :  { %129 = vsyncadd [#allocation7], 4294967280 }
  0x1b   :  { %43 = sfence }
  0x1c   :  { %s44_s1 = sld [smem:[#allocation3]]  ;;  %s75_s25 = sld [smem:[#allocation3 + $0x1]]  ;;  %v53_v0 = vld [vmem:[%s187_s3] sm:$0x1]  ;;  %vm57_vm0 = vcmask 8192  }
  0x1d   :  { %s45_s24 = sld [smem:[#allocation6]]  ;;  %s76_s26 = sld [smem:[#allocation6 + $0x1]] }
  0x1e   :  { %s134_s9 = smov [#allocation8]  }
  0x1f   :  { %s65_s10 = sshll.u32 %s134_s9, 4  ;;  %s66_s10 = int_to_ptr.vmem [resolvable:$true] %s65_s10 }
  0x20   :  { %s104_s11 = scalar_lea.vmem %s66_s10, 16  ;;  %s108_s12 = scalar_lea.vmem %s66_s10, 32 }
  0x21   :  { %p105_p10 = scmp.ne.s32.totalorder %s66_s10, %s104_s11  ;;  %p109_p11 = scmp.lt.s32.totalorder %s66_s10, %s66_s10 }
  0x22   :  { %p110_p12 = scmp.lt.s32.totalorder %s108_s12, %s104_s11 }
  0x23   :  { %s46_s27 = smul.f32 %s45_s24, %s44_s1 }
  0x24   :  { %s49_s28 = smul.f32 %s76_s26, %s75_s25  ;;  %p111_p13 = por %p110_p12, %p109_p11 }
  0x26   :  { %s50_s29 = sadd.f32 %s49_s28, %s46_s27  ;;  %p112_p0 = pnand %p111_p13, %p105_p10 }
  0x28   :  { %s52_s6 = sadd.f32 %s50_s29, %s186_s2 }
  0x2a   :  { %v54_v1 = vstv %s52_s6 }
  0x2b   :  { %v55_v2 = vadd.f32 %v54_v1, %v53_v0 }
  0x2d   :  { %v56_v3 = vmax.f32 %v55_v2, 0.0 }
  0x2f   :  { %58 = vst.msk [vmem:[#allocation8] sm:$0x1] %vm57_vm0, %v56_v3 }
  0x30   :  { %115 = shalt.err (!%p112_p0)
}
  0x31   :  { %s116_s3 = scalar_lea.hbm %s188_s4, 16 }
  0x32   :  { %p117_p1 = scmp.ne.s32.totalorder %s188_s4, %s116_s3  ;;  %p120_p2 = scmp.lt.u32.totalorder %s116_s3, %s188_s4 }
  0x34   :  { %p122_p3 = pnand %p120_p2, %p117_p1 }
  0x36   :  { %125 = shalt.err (!%p122_p3)
}
  0x37   :  { %68 = dma.vmem_to_hbm [thread:$0]  %s66_s10, 16, %s188_s4, [#allocation4]  }
  0x38   :  { %130 = dma.done.wait [#allocation4], 16  }
  0x39   :  { %131 = vsyncadd [#allocation4], 4294967280 }
  0x3a   :  { %72 = vsyncpa [#allocation4], 1 }
  0x3b   :  { %73 = vsyncpa [#allocation5], 1 }
  0x3c   :  { %74 = vsyncpa [#allocation7], 1 }

</bundles_post_ra>
